<compile_context>
chip_gen: v7x
topology: tpu7x:2x2x1
jax: 0.10.0
libtpu: 0.0.40
codegen_flags: <defaults>
</compile_context>

<pallas_src>
import functools

import jax
import jax.numpy as jnp
from jax import lax
from jax.experimental import pallas as pl
from jax.experimental.pallas import tpu as pltpu

_NEG_BIG = -1e30          # "-inf" that never produces inf-inf NaNs
_EPS = 1e-12              # PyTorch F.normalize default eps


def _round_up(x, m):
    return ((x + m - 1) // m) * m


def _infonce_kernel(img_ref, touch_ref, out_ref, l_ref, tgt_ref, *,
                    inv_temp, batch, block_b, exp_dtype):
    i = pl.program_id(0)               # row tile of img / logits
    j = pl.program_id(1)               # col tile of logits (row tile of touch)
    n_col = pl.num_programs(1)
    has_pad = (batch % block_b) != 0   # static Python bool

    # ---- once per row tile: reset accumulators (inputs are pre-normalized)
    @pl.when(j == 0)
    def _():
        l_ref[...] = jnp.zeros_like(l_ref)
        tgt_ref[...] = jnp.zeros_like(tgt_ref)

    # ---- logits tile: contract D with D directly (no explicit transpose)
    s = lax.dot_general(
        img_ref[...], touch_ref[...],
        dimension_numbers=(((1,), (1,)), ((), ())),
        preferred_element_type=jnp.float32)                        # [TM, TN]

    # ---- target logit (the diagonal) lives only in the diagonal block:
    # reuse the MXU result instead of a second row-wise dot over D.
    @pl.when(j == i)
    def _():
        rows = lax.broadcasted_iota(jnp.int32, s.shape, 0)
        cols = lax.broadcasted_iota(jnp.int32, s.shape, 1)
        tgt_ref[...] = jnp.sum(jnp.where(rows == cols, s, 0.0),
                               axis=-1, keepdims=True)

    if has_pad:  # mask padded touch columns (lane-vector mask, broadcast)
        col_ids = j * block_b + lax.broadcasted_iota(jnp.int32, (1, block_b), 1)
        s = jnp.where(col_ids < batch, s, _NEG_BIG)

    # ---- fixed-max softmax accumulation: |s| <= 1/T, so exp(s - 1/T) <= 1
    # (no running max, no alpha rescale).
    p = jnp.exp((s - inv_temp).astype(exp_dtype))
    l_ref[...] += jnp.sum(p.astype(jnp.float32), axis=-1, keepdims=True)

    # ---- finalize: per-row  logsumexp - target_logit
    @pl.when(j == n_col - 1)
    def _():
        per_row = inv_temp + jnp.log(l_ref[...]) - tgt_ref[...]    # [TM, 1]
        if has_pad:
            row_ids = i * block_b + lax.broadcasted_iota(
                jnp.int32, per_row.shape, 0)
            per_row = jnp.where(row_ids < batch, per_row, 0.0)
        out_ref[...] = per_row


def _normalize(x):
    x = x.astype(jnp.float32)
    ssq = jnp.sum(x * x, axis=-1, keepdims=True)
    return x * lax.rsqrt(jnp.maximum(ssq, jnp.float32(_EPS * _EPS)))


def _infonce_reference(img_out, touch_out, temperature=0.07):
    # Pure-JAX reference (also used for tiny, launch-overhead-dominated shapes).
    def norm(x):
        x = x.astype(jnp.float32)
        return x / jnp.maximum(
            jnp.sqrt(jnp.sum(x * x, axis=-1, keepdims=True)), _EPS)
    i, t = norm(img_out), norm(touch_out)
    logits = (i @ t.T) / jnp.float32(temperature)
    n = logits.shape[0]
    logp = jax.nn.log_softmax(logits, axis=-1)
    return -jnp.mean(logp[jnp.arange(n), jnp.arange(n)])


def _device_kind():
    try:
        return jax.devices()[0].device_kind.lower()
    except Exception:
        return ""


def _vmem_capacity_bytes():
    try:
        return int(pltpu.get_tpu_info().vmem_capacity_bytes)
    except Exception:
        return 64 * 1024 * 1024      # conservative default (v7x)


def infonce_loss(img_out, touch_out, temperature=0.07, *,
                 matmul_dtype=jnp.bfloat16, block_b=None, force_kernel=False):
    """InfoNCE loss (== InfoNCELoss.forward). img_out, touch_out: [B, D]."""
    assert img_out.shape == touch_out.shape and img_out.ndim == 2
    B, D = img_out.shape

    # Tiny problems are pallas_call-overhead dominated; let XLA fuse them.
    if not force_kernel and (B * B + 2 * B * D) < 256 * 1024:
        return _infonce_reference(img_out, touch_out, temperature)

    kind = _device_kind()
    inv_temp = float(1.0 / temperature)

    # O(B*D) prologue in plain JAX: normalize, fold 1/T into img, cast once.
    img_n = (_normalize(img_out) * jnp.float32(inv_temp)).astype(matmul_dtype)
    touch_n = _normalize(touch_out).astype(matmul_dtype)

    # Generation-tuned default tile: 512 clears the bf16 roofline ridge on
    # v5e/v7x; v6e wants ~1024.
    if block_b is None:
        block_b = 1024 if "v6" in kind else 512

    d_pad = _round_up(D, 128)
    b8 = _round_up(B, 8)
    blk = _round_up(min(block_b, b8), 8)
    # Keep >= 2 row tiles so both of v7x's TensorCores get work along the
    # "parallel" axis (harmless elsewhere: one extra re-stream of touch).
    if blk >= b8 and b8 >= 16:
        blk = _round_up(b8 // 2, 8)

    mm_itemsize = jnp.dtype(matmul_dtype).itemsize
    # bf16 exp only where the EUP is natively bf16 (v6e/v7x) and the matmul is
    # short enough that the EUP is the saturated unit.  Never on v5e.
    use_bf16_exp = (matmul_dtype != jnp.float32 and d_pad <= 512
                    and any(g in kind for g in ("v6", "v7")))
    exp_dtype = jnp.bfloat16 if use_bf16_exp else jnp.float32
    exp_itemsize = jnp.dtype(exp_dtype).itemsize

    def _vmem_est(tb):
        return (2 * 2 * tb * d_pad * mm_itemsize      # img + touch, dbl-buffered
                + tb * tb * 4                         # logits tile (f32)
                + tb * tb * (exp_itemsize + 4)        # exp + its f32 cast
                + 2 * tb * 4                          # l / tgt accumulators
                + 2 * tb * 4)                         # output block, dbl-buffered

    vmem_cap = _vmem_capacity_bytes()
    vmem_ceiling = int(0.8 * vmem_cap)                # generation-aware cap
    while blk > 8 and int(1.25 * _vmem_est(blk)) > vmem_ceiling:
        blk = max(8, _round_up(blk // 2, 8))

    b_pad = _round_up(B, blk)
    n_tiles = b_pad // blk

    img_p = jnp.pad(img_n, ((0, b_pad - B), (0, d_pad - D)))
    touch_p = jnp.pad(touch_n, ((0, b_pad - B), (0, d_pad - D)))

    kernel = functools.partial(
        _infonce_kernel, inv_temp=inv_temp, batch=B, block_b=blk,
        exp_dtype=exp_dtype)

    vmem_limit = int(min(max(int(1.25 * _vmem_est(blk)), 8 * 1024 * 1024),
                         vmem_ceiling))

    cost = pl.CostEstimate(
        flops=2 * b_pad * b_pad * d_pad + 4 * b_pad * b_pad,
        transcendentals=b_pad * b_pad + b_pad,
        # touch is re-streamed once per row tile; img once.
        bytes_accessed=(n_tiles + 1) * b_pad * d_pad * mm_itemsize + b_pad * 4)

    per_row = pl.pallas_call(
        kernel,
        out_shape=jax.ShapeDtypeStruct((b_pad, 1), jnp.float32),
        grid_spec=pltpu.PrefetchScalarGridSpec(
            num_scalar_prefetch=0,
            grid=(n_tiles, n_tiles),
            in_specs=[
                pl.BlockSpec((blk, d_pad), lambda i, j: (i, 0)),   # img rows
                pl.BlockSpec((blk, d_pad), lambda i, j: (j, 0)),   # touch rows
            ],
            out_specs=pl.BlockSpec((blk, 1), lambda i, j: (i, 0)),
            scratch_shapes=[
                pltpu.VMEM((blk, 1), jnp.float32),    # running sum-exp
                pltpu.VMEM((blk, 1), jnp.float32),    # target logit
            ]),
        compiler_params=pltpu.CompilerParams(
            dimension_semantics=("parallel", "arbitrary"),
            vmem_limit_bytes=vmem_limit),
        cost_estimate=cost,
    )(img_p, touch_p)

    # Padded rows were zeroed in-kernel; mean over the true batch.
    return jnp.sum(per_row) / jnp.float32(B)


if __name__ == "__main__":
    key = jax.random.PRNGKey(0)
    k1, k2 = jax.random.split(key)
    B, D = 8, 32  # small synthetic shapes: batch of 8 embeddings, hidden = 32
    img_out = jax.random.normal(k1, (B, D), dtype=jnp.float32)
    touch_out = jax.random.normal(k2, (B, D), dtype=jnp.float32)

    ref = _infonce_reference(img_out, touch_out, 0.07)

    # f32-MXU path: tight check against the pure-JAX reference.
    loss_f32 = infonce_loss(img_out, touch_out, 0.07,
                            matmul_dtype=jnp.float32, force_kernel=True)
    jax.block_until_ready(loss_f32)
    assert jnp.allclose(loss_f32, ref, atol=1e-4, rtol=1e-4), (loss_f32, ref)

    # Default bf16-streaming path (the v5e/v6e/v7x perf configuration).
    loss_bf16 = infonce_loss(img_out, touch_out, 0.07, force_kernel=True)
    jax.block_until_ready(loss_bf16)
    assert jnp.allclose(loss_bf16, ref, atol=1e-1, rtol=5e-2), (loss_bf16, ref)

    print("KERNEL_OK")
</pallas_src>

<mosaic_0001>
module attributes {stable_mosaic.version = 11 : i64} {
  func.func @_infonce_kernel(%arg0: i32, %arg1: i32, %arg2: memref<8x128xf32, #tpu.memory_space<vmem>>, %arg3: memref<8x128xf32, #tpu.memory_space<vmem>>, %arg4: memref<8x1xf32, #tpu.memory_space<vmem>>, %arg5: memref<8x1xf32, #tpu.memory_space<vmem>>, %arg6: memref<8x1xf32, #tpu.memory_space<vmem>>) attributes {dimension_semantics = [#tpu.dimension_semantics<parallel>, #tpu.dimension_semantics<arbitrary>], iteration_bounds = array<i64: 1, 1>, scalar_prefetch = 0 : i64, scratch_operands = 2 : i64, tpu.core_type = #tpu.core_type<tc>, window_params = [{transform_indices = @transform_0, window_bounds = array<i64: 8, 128>}, {transform_indices = @transform_1, window_bounds = array<i64: 8, 128>}, {transform_indices = @transform_2, window_bounds = array<i64: 8, 1>}]} {
    %c0_i32 = arith.constant 0 : i32
    %0 = arith.cmpi eq, %arg1, %c0_i32 : i32
    %1 = arith.extui %0 : i1 to i32
    %c0_i32_0 = arith.constant 0 : i32
    %2 = arith.cmpi ne, %1, %c0_i32_0 : i32
    scf.if %2 {
      %cst_13 = arith.constant 0.000000e+00 : f32
      %20 = vector.broadcast %cst_13 : f32 to vector<8x1xf32>
      %c0_14 = arith.constant 0 : index
      %c0_15 = arith.constant 0 : index
      %21 = vector.load %arg5[%c0_14, %c0_15] : memref<8x1xf32, #tpu.memory_space<vmem>>, vector<8x1xf32>
      tpu.vector_store %arg5[%c0_14, %c0_15], %20 {strides = array<i32>} : memref<8x1xf32, #tpu.memory_space<vmem>>, vector<8x1xf32>,
      %cst_16 = arith.constant 0.000000e+00 : f32
      %22 = vector.broadcast %cst_16 : f32 to vector<8x1xf32>
      %c0_17 = arith.constant 0 : index
      %c0_18 = arith.constant 0 : index
      %23 = vector.load %arg6[%c0_17, %c0_18] : memref<8x1xf32, #tpu.memory_space<vmem>>, vector<8x1xf32>
      tpu.vector_store %arg6[%c0_17, %c0_18], %22 {strides = array<i32>} : memref<8x1xf32, #tpu.memory_space<vmem>>, vector<8x1xf32>,
    } else {
    }
    %c0 = arith.constant 0 : index
    %c0_1 = arith.constant 0 : index
    %3 = vector.load %arg2[%c0, %c0_1] : memref<8x128xf32, #tpu.memory_space<vmem>>, vector<8x128xf32>
    %c0_2 = arith.constant 0 : index
    %c0_3 = arith.constant 0 : index
    %4 = vector.load %arg3[%c0_2, %c0_3] : memref<8x128xf32, #tpu.memory_space<vmem>>, vector<8x128xf32>
    %cst = arith.constant dense<0.000000e+00> : vector<8x8xf32>
    %5 = tpu.matmul %3, %4, %cst {dimension_numbers = #tpu.dot_dimension_numbers<[1], [1], [0], [0], [0, 0, 1, 0], [], []>} : vector<8x128xf32>, vector<8x128xf32>, vector<8x8xf32> -> vector<8x8xf32>
    %6 = arith.cmpi eq, %arg1, %arg0 : i32
    %7 = arith.extui %6 : i1 to i32
    %c0_i32_4 = arith.constant 0 : i32
    %8 = arith.cmpi ne, %7, %c0_i32_4 : i32
    scf.if %8 {
      %20 = tpu.iota {dimensions = array<i32: 0>} : vector<8x8xi32>
      %21 = tpu.iota {dimensions = array<i32: 1>} : vector<8x8xi32>
      %22 = arith.cmpi eq, %20, %21 : vector<8x8xi32>
      %cst_13 = arith.constant 0.000000e+00 : f32
      %23 = vector.broadcast %cst_13 : f32 to vector<8x8xf32>
      %24 = arith.select %22, %5, %23 : vector<8x8xi1>, vector<8x8xf32>
      %cst_14 = arith.constant dense<0.000000e+00> : vector<8xf32>
      %25 = vector.multi_reduction <add>, %24, %cst_14 [1] : vector<8x8xf32> to vector<8xf32>
      %26 = vector.shape_cast %25 : vector<8xf32> to vector<8x1xf32>
      %c0_15 = arith.constant 0 : index
      %c0_16 = arith.constant 0 : index
      %27 = vector.load %arg6[%c0_15, %c0_16] : memref<8x1xf32, #tpu.memory_space<vmem>>, vector<8x1xf32>
      tpu.vector_store %arg6[%c0_15, %c0_16], %26 {strides = array<i32>} : memref<8x1xf32, #tpu.memory_space<vmem>>, vector<8x1xf32>,
    } else {
    }
    %cst_5 = arith.constant 14.2857141 : f32
    %9 = vector.broadcast %cst_5 : f32 to vector<8x8xf32>
    %10 = arith.subf %5, %9 : vector<8x8xf32>
    %11 = math.exp %10 : vector<8x8xf32>
    %c0_6 = arith.constant 0 : index
    %c0_7 = arith.constant 0 : index
    %12 = vector.load %arg5[%c0_6, %c0_7] : memref<8x1xf32, #tpu.memory_space<vmem>>, vector<8x1xf32>
    %cst_8 = arith.constant dense<0.000000e+00> : vector<8xf32>
    %13 = vector.multi_reduction <add>, %11, %cst_8 [1] : vector<8x8xf32> to vector<8xf32>
    %14 = vector.shape_cast %13 : vector<8xf32> to vector<8x1xf32>
    %15 = arith.addf %12, %14 : vector<8x1xf32>
    %c0_9 = arith.constant 0 : index
    %c0_10 = arith.constant 0 : index
    %16 = vector.load %arg5[%c0_9, %c0_10] : memref<8x1xf32, #tpu.memory_space<vmem>>, vector<8x1xf32>
    tpu.vector_store %arg5[%c0_9, %c0_10], %15 {strides = array<i32>} : memref<8x1xf32, #tpu.memory_space<vmem>>, vector<8x1xf32>,
    %c0_i32_11 = arith.constant 0 : i32
    %17 = arith.cmpi eq, %arg1, %c0_i32_11 : i32
    %18 = arith.extui %17 : i1 to i32
    %c0_i32_12 = arith.constant 0 : i32
    %19 = arith.cmpi ne, %18, %c0_i32_12 : i32
    scf.if %19 {
      %c0_13 = arith.constant 0 : index
      %c0_14 = arith.constant 0 : index
      %20 = vector.load %arg5[%c0_13, %c0_14] : memref<8x1xf32, #tpu.memory_space<vmem>>, vector<8x1xf32>
      %21 = math.log %20 : vector<8x1xf32>
      %cst_15 = arith.constant 14.2857141 : f32
      %22 = vector.broadcast %cst_15 : f32 to vector<8x1xf32>
      %23 = arith.addf %22, %21 : vector<8x1xf32>
      %c0_16 = arith.constant 0 : index
      %c0_17 = arith.constant 0 : index
      %24 = vector.load %arg6[%c0_16, %c0_17] : memref<8x1xf32, #tpu.memory_space<vmem>>, vector<8x1xf32>
      %25 = arith.subf %23, %24 : vector<8x1xf32>
      %c0_18 = arith.constant 0 : index
      %c0_19 = arith.constant 0 : index
      %26 = vector.load %arg4[%c0_18, %c0_19] : memref<8x1xf32, #tpu.memory_space<vmem>>, vector<8x1xf32>
      tpu.vector_store %arg4[%c0_18, %c0_19], %25 {strides = array<i32>} : memref<8x1xf32, #tpu.memory_space<vmem>>, vector<8x1xf32>,
    } else {
    }
    return
  }
  func.func @transform_0(%arg0: i32, %arg1: i32) -> (i32, i32) {
    %c0_i32 = arith.constant 0 : i32
    %c0_i32_0 = arith.constant 0 : i32
    return %arg0, %c0_i32 : i32, i32
  }
  func.func @transform_1(%arg0: i32, %arg1: i32) -> (i32, i32) {
    %c0_i32 = arith.constant 0 : i32
    %c0_i32_0 = arith.constant 0 : i32
    return %arg1, %c0_i32 : i32, i32
  }
  func.func @transform_2(%arg0: i32, %arg1: i32) -> (i32, i32) {
    %c0_i32 = arith.constant 0 : i32
    %c0_i32_0 = arith.constant 0 : i32
    return %arg0, %c0_i32 : i32, i32
  }
}

</mosaic_0001>

<bundles_post_ra>
// kernel: tpu_custom_call.1
= control target key start
LH: loop header
LB: loop body
LE: loop exit
PB: predicated region body
PF: predicated region fallthrough
CT: control target
= control target key end

     0   :  { %7 = vsyncpa [#allocation5], 0  ;;  %s272_s0 = inlined_call_operand.hbm [shape: f32[8,128], index: 0, kind: input, shape index: {}]   ;;  %s273_s1 = inlined_call_operand.hbm [shape: f32[8,128], index: 1, kind: input, shape index: {}]   ;;  %s274_s2 = inlined_call_operand.vmem [shape: f32[8,1], index: 2, kind: output, shape index: {}]  }
   0x1   :  { %8 = vsyncpa [#allocation7], 0  ;;  %s221_s9 = smov [#allocation4]   ;;  %s222_s11 = smov [#allocation6]  }
   0x2   :  { %s15_s10 = sshll.u32 %s221_s9, 4  ;;  %s25_s12 = sshll.u32 %s222_s11, 4  ;;  %s16_s10 = int_to_ptr.vmem [resolvable:$true] %s15_s10  ;;  %s26_s12 = int_to_ptr.vmem [resolvable:$true] %s25_s12 }
   0x3   :  { %s173_s15 = scalar_lea.hbm %s272_s0, 128 }
   0x4   :  { %p174_p0 = scmp.ne.s32.totalorder %s272_s0, %s173_s15  ;;  %p177_p1 = scmp.lt.u32.totalorder %s173_s15, %s272_s0 }
   0x6   :  { %p179_p2 = pnand %p177_p1, %p174_p0 }
   0x8   :  { %182 = shalt.err (!%p179_p2)
}
   0x9   :  { %s183_s20 = scalar_lea.vmem %s16_s10, 128  ;;  %p188_p4 = scmp.lt.s32.totalorder %s16_s10, %s16_s10 }
   0xa   :  { %p184_p3 = scmp.ne.s32.totalorder %s16_s10, %s183_s20  ;;  %p189_p5 = scmp.lt.s32.totalorder %s183_s20, %s183_s20 }
   0xc   :  { %p190_p6 = por %p189_p5, %p188_p4 }
   0xe   :  { %p191_p7 = pnand %p190_p6, %p184_p3 }
  0x10   :  { %194 = shalt.err (!%p191_p7)
}
  0x11   :  { %18 = dma.hbm_to_vmem [thread:$0]  %s272_s0, 128, %s16_s10, [#allocation5]  }
  0x12   :  { %s195_s25 = scalar_lea.hbm %s273_s1, 128 }
  0x13   :  { %p196_p8 = scmp.ne.s32.totalorder %s273_s1, %s195_s25  ;;  %p199_p9 = scmp.lt.u32.totalorder %s195_s25, %s273_s1 }
  0x15   :  { %p201_p10 = pnand %p199_p9, %p196_p8 }
  0x17   :  { %204 = shalt.err (!%p201_p10)
}
  0x18   :  { %s205_s30 = scalar_lea.vmem %s26_s12, 128  ;;  %p210_p12 = scmp.lt.s32.totalorder %s26_s12, %s26_s12 }
  0x19   :  { %p206_p11 = scmp.ne.s32.totalorder %s26_s12, %s205_s30  ;;  %p211_p13 = scmp.lt.s32.totalorder %s205_s30, %s205_s30 }
  0x1b   :  { %p212_p0 = por %p211_p13, %p210_p12 }
  0x1d   :  { %p213_p1 = pnand %p212_p0, %p206_p11 }
  0x1f   :  { %216 = shalt.err (!%p213_p1)
}
  0x20   :  { %28 = dma.hbm_to_vmem [thread:$0]  %s273_s1, 128, %s26_s12, [#allocation7]  }
  0x21   :  { %217 = dma.done.wait [#allocation5], 128  }
  0x22   :  { %218 = vsyncadd [#allocation5], 4294967168 }
  0x23   :  { %219 = dma.done.wait [#allocation7], 128  }
  0x24   :  { %220 = vsyncadd [#allocation7], 4294967168  ;;  %vm39_vm0 = vcmask 7168   ;;  %v223_v0 = vmov 0.0   ;;  %vm224_vm1 = vmmov 0   ;;  %v43_v1 = vld [vmem:[#allocation6] sm:$0xff]  ;;  %v118_v7 = vlaneseq }
  0x25   :  { %40 = vst.msk [vmem:[#allocation2] sm:$0xff] %vm39_vm0, %v223_v0  ;;  %160 = vmatprep.subr.mxu0 %v223_v0  ;;  %41 = vst.msk [vmem:[#allocation3] sm:$0xff] %vm39_vm0, %v223_v0  ;;  %162 = vmatprep.mubr.msk.f32.mxu0 %vm224_vm1, %v223_v0  ;;  %v42_v2 = vld [vmem:[#allocation4] sm:$0xff]  ;;  %vm124_vm3 = vcmask 64512  }
  0x26   :  { %161 = vmatpush3.xpose.msra.mxu0 %v43_v1  ;;  %v119_v8 = vshrl.u32 %v118_v7, 7  ;;  %v121_v9 = vand.u32 127, %v118_v7 }
  0x28   :  { %vm122_vm2 = vcmp.eq.s32.totalorder %v119_v8, %v121_v9 }
  0x29   :  { %163 = vmatmul.mubr.f32.vlgmr.msra.gmra.mrb[0].mxu0 %v42_v2 }
  0x2c   :  { %v133_v14 = vld [vmem:[#allocation2] sm:$0xff] }
  0xfc   :  { %v110_v3 = vpop.f32.mrb[0].mxu0 }
  0xfd   :  { %v157_v4 = vadd.f32 -14.285714, %v110_v3  ;;  %v164_v5 = vpop.f32.mrb[1].mxu0  ;;  %v123_v12 = vsel %vm122_vm2, %v110_v3, 0.0 }
  0xfe   :  { %v125_v13 = vsel %vm124_vm3, %v123_v12, 0.0 }
  0xff   :  { %v131_v6 = vmul.f32 1.442695, %v157_v4 }
 0x101   :  { %169 = vpow2.f32 %v131_v6 }
 0x10b   :  { %v170_v10 = vpop.eup %169 }
 0x10c   :  { %v135_v11 = vsel %vm124_vm3, %v170_v10, 0.0 }
 0x10d   :  { %136 = vadd.xlane.f32.xlu0 %v135_v11 }
 0x111   :  { %126 = vadd.xlane.f32.xlu0 %v125_v13 }
 0x19a   :  { %v137_v15 = vpop.xlane.xlu0 %136 }
 0x19b   :  { %v138_v16 = vadd.f32 %v137_v15, %v133_v14 }
 0x19d   :  { %140 = vst.msk [vmem:[#allocation2] sm:$0xff] %vm39_vm0, %v138_v16 }
 0x19e   :  { %v127_v17 = vpop.xlane.xlu0 %126 }
 0x19f   :  { %129 = vst.msk [vmem:[#allocation3] sm:$0xff] %vm39_vm0, %v127_v17 }
 0x1a4   :  { %v144_v18 = vld [vmem:[#allocation2] sm:$0xff] }
 0x1a5   :  { %171 = vlog2.f32 %v144_v18 }
 0x1a6   :  { %v148_v22 = vld [vmem:[#allocation3] sm:$0xff] }
 0x1af   :  { %v172_v19 = vpop.eup %171 }
 0x1b0   :  { %v146_v20 = vmul.f32 0.6931472, %v172_v19 }
 0x1b2   :  { %v147_v21 = vadd.f32 14.285714, %v146_v20 }
 0x1b4   :  { %v149_v23 = vsub.f32 %v147_v21, %v148_v22 }
 0x1b6   :  { %150 = vst.msk [vmem:[%s274_s2] sm:$0xff] %vm39_vm0, %v149_v23 }
 0x1b7   :  { %155 = vsyncpa [#allocation5], 1 }
 0x1b8   :  { %156 = vsyncpa [#allocation7], 1 }

</bundles_post_ra>
